<compile_context>
chip_gen: v7x
topology: tpu7x:2x2x1
jax: 0.10.0
libtpu: 0.0.40
codegen_flags: <defaults>
</compile_context>

<pallas_src>
import functools

import jax
import jax.numpy as jnp
from jax import lax
from jax.experimental import pallas as pl
from jax.experimental.pallas import tpu as pltpu

# ---- problem sizes (small, consistent with the module) -----------------------
HIDDEN = 32            # bert_config.hidden_size (small synthetic config)
EMB = 256              # hidden_dim in the module (hard-coded 256)
LAB = EMB + 1          # label_linear output = hidden_dim + 1 (weight | bias)
NUM_CLASSES = 4
NUM_SHOTS = 2
B_SUP = NUM_CLASSES * NUM_SHOTS   # support batch = 8
B_QRY = 8                         # query batch
NUM_TASKS = 4                     # tasks batched into one pallas_call
LANE = 128                        # lane-dense output width


def _leopard_task_kernel(feats_ref, wc_ref, bc_ref, wb_ref, bb_ref, avg_ref, qlab_ref,
                         logits_ref, stats_ref, *, num_classes, b_sup, b_qry, emb):
    """One task per grid step: fused projections + prototype classifier + CE + acc."""
    feats = feats_ref[0]                                   # [b_sup+b_qry, H]

    # Single fused projection through [linear | label_linear[:, :emb]]  -> [*, 2*emb]
    comb = jnp.dot(feats, wc_ref[...],
                   preferred_element_type=jnp.float32) + bc_ref[...]
    lab_w = comb[:b_sup, emb:]                             # [b_sup, emb]  (tile-aligned slices)
    q_embs = comb[b_sup:, :emb]                            # [b_qry, emb]

    # label_linear bias column (the 257th output) on the VPU/XLU: [b_sup, 1]
    fs = feats[:b_sup, :]
    lab_b = jnp.sum(fs * wb_ref[...], axis=-1, keepdims=True) + bb_ref[...]

    # A = per-class averaging matrix (one-hot / class count), zero-padded to 128 lanes.
    A = avg_ref[0]                                         # [b_sup, LANE]

    # logits = q_embs @ (A^T @ lab_w)^T + A^T @ lab_b  ==  (q_embs @ lab_w^T) @ A + sum_s(A*lab_b)
    s_mat = lax.dot_general(q_embs, lab_w, (((1,), (1,)), ((), ())),
                            preferred_element_type=jnp.float32)         # [b_qry, b_sup]
    proto_b = jnp.sum(A * lab_b, axis=0, keepdims=True)                 # [1, LANE]
    logits = jnp.dot(s_mat, A,
                     preferred_element_type=jnp.float32) + proto_b      # [b_qry, LANE]
    logits_ref[0] = logits                    # lane-dense store; cols >= num_classes are 0

    # ---- cross-entropy + accuracy over the query set (valid lanes only) ------
    qlab = qlab_ref[0]                                     # [b_qry, LANE] one-hot, zero-padded
    col = lax.broadcasted_iota(jnp.int32, logits.shape, 1)
    valid = col < num_classes
    lm = jnp.where(valid, logits, jnp.full_like(logits, -1e30))
    row_max = jnp.max(lm, axis=-1, keepdims=True)                        # [b_qry, 1]
    lse = jnp.log(jnp.sum(jnp.exp(lm - row_max), axis=-1,
                          keepdims=True)) + row_max                      # [b_qry, 1]
    true_logit = jnp.sum(qlab * logits, axis=-1, keepdims=True)          # [b_qry, 1]
    loss = jnp.sum(lse - true_logit, axis=0, keepdims=True) * (1.0 / b_qry)   # [1, 1]

    # accuracy (first-index argmax, matching torch.argmax tie-breaking)
    pred = jnp.min(jnp.where(lm >= row_max, col, LANE), axis=-1, keepdims=True)
    lab_idx = jnp.min(jnp.where(qlab > 0.5, col, LANE), axis=-1, keepdims=True)
    correct = (pred == lab_idx).astype(jnp.float32)
    acc = jnp.sum(correct, axis=0, keepdims=True) * (1.0 / b_qry)             # [1, 1]

    # Fold both scalars into one lane-dense stats row: lane 0 = loss, lane 1 = acc.
    col1 = lax.broadcasted_iota(jnp.int32, (1, LANE), 1)
    stats = jnp.where(col1 == 0, loss, jnp.where(col1 == 1, acc, jnp.zeros_like(loss)))
    stats_ref[0] = stats


@functools.partial(jax.jit, static_argnames=("num_classes",))
def leopard_head(support_feats, query_feats, w_lin_t, b_lin, w_lab_t, b_lab,
                 support_labels, query_labels, *, num_classes):
    """Batched Leopard head over independent meta-learning tasks.

    support_feats: [T, B_SUP, H]  pooled BERT features (support set)
    query_feats:   [T, B_QRY, H]  pooled BERT features (query set)
    w_lin_t: [H, EMB], b_lin: [1, EMB]          nn.Linear(H, 256), pre-transposed
    w_lab_t: [H, EMB+1], b_lab: [1, EMB+1]      nn.Linear(H, 257), pre-transposed
    support_labels/query_labels: [T, B_SUP] / [T, B_QRY] int32 class ids
    Returns per-task (logits [T, B_QRY, C], loss [T], acc [T]).
    """
    n_tasks, b_sup, hidden = support_feats.shape
    b_qry = query_feats.shape[1]
    emb = w_lin_t.shape[1]
    assert w_lab_t.shape == (hidden, emb + 1)
    assert num_classes <= LANE

    # Fuse the two projections: combined [H, 2*EMB] weight, support+query stacked rows.
    w_comb = jnp.concatenate([w_lin_t, w_lab_t[:, :emb]], axis=1)        # [H, 2*EMB]
    b_comb = jnp.concatenate([b_lin, b_lab[:, :emb]], axis=1)            # [1, 2*EMB]
    w_bias_col = jnp.transpose(w_lab_t[:, emb:])                         # [1, H]
    b_bias_col = b_lab[:, emb:]                                          # [1, 1]
    feats = jnp.concatenate([support_feats, query_feats], axis=1)        # [T, B_SUP+B_QRY, H]

    # Per-class averaging matrix (one-hot / count), zero-padded to a full 128-lane tile.
    onehot_s = jax.nn.one_hot(support_labels, num_classes, dtype=jnp.float32)  # [T, B_SUP, C]
    counts = jnp.sum(onehot_s, axis=1, keepdims=True)
    avg = onehot_s / jnp.maximum(counts, 1.0)                            # guard empty classes
    avg_pad = jnp.pad(avg, ((0, 0), (0, 0), (0, LANE - num_classes)))    # [T, B_SUP, LANE]
    onehot_q = jax.nn.one_hot(query_labels, num_classes, dtype=jnp.float32)
    qlab_pad = jnp.pad(onehot_q, ((0, 0), (0, 0), (0, LANE - num_classes)))  # [T, B_QRY, LANE]

    kernel = functools.partial(_leopard_task_kernel, num_classes=num_classes,
                               b_sup=b_sup, b_qry=b_qry, emb=emb)
    logits_slab, stats = pl.pallas_call(
        kernel,
        grid=(n_tasks,),
        in_specs=[
            pl.BlockSpec((1, b_sup + b_qry, hidden), lambda t: (t, 0, 0)),   # per-task features
            pl.BlockSpec((hidden, 2 * emb), lambda t: (0, 0)),               # shared combined weight
            pl.BlockSpec((1, 2 * emb), lambda t: (0, 0)),                    # shared combined bias
            pl.BlockSpec((1, hidden), lambda t: (0, 0)),                     # label bias-column weight
            pl.BlockSpec((1, 1), lambda t: (0, 0)),                          # label bias-column bias
            pl.BlockSpec((1, b_sup, LANE), lambda t: (t, 0, 0)),             # averaging matrix (padded)
            pl.BlockSpec((1, b_qry, LANE), lambda t: (t, 0, 0)),             # query one-hot (padded)
        ],
        out_specs=(
            pl.BlockSpec((1, b_qry, LANE), lambda t: (t, 0, 0)),             # lane-dense logits slab
            pl.BlockSpec((1, 1, LANE), lambda t: (t, 0, 0)),                 # stats row (loss, acc)
        ),
        out_shape=(
            jax.ShapeDtypeStruct((n_tasks, b_qry, LANE), jnp.float32),
            jax.ShapeDtypeStruct((n_tasks, 1, LANE), jnp.float32),
        ),
        compiler_params=pltpu.CompilerParams(dimension_semantics=("parallel",)),
    )(feats, w_comb, b_comb, w_bias_col, b_bias_col, avg_pad, qlab_pad)

    logits = logits_slab[:, :, :num_classes]
    loss = stats[:, 0, 0]
    acc = stats[:, 0, 1]
    return logits, loss, acc


def _reference_single(support_feats, query_feats, w_lin_t, b_lin, w_lab_t, b_lab,
                      support_labels, query_labels, num_classes):
    """Pure-JAX per-task reference mirroring the PyTorch forward_task head semantics."""
    label_embs = support_feats @ w_lab_t + b_lab                         # [B_SUP, 257]
    onehot = jax.nn.one_hot(support_labels, num_classes)
    proto = (onehot.T @ label_embs) / jnp.sum(onehot, axis=0)[:, None]   # [C, 257]
    q_embs = query_feats @ w_lin_t + b_lin                               # [B_QRY, 256]
    logits = q_embs @ proto[:, :-1].T + proto[:, -1]                     # [B_QRY, C]
    logp = jax.nn.log_softmax(logits, axis=-1)
    loss = -jnp.mean(logp[jnp.arange(query_labels.shape[0]), query_labels])
    acc = jnp.mean((jnp.argmax(logits, axis=-1) == query_labels).astype(jnp.float32))
    return logits, loss, acc


if __name__ == "__main__":
    key = jax.random.PRNGKey(0)
    k_fs, k_fq, k_wl, k_bl, k_wlab, k_blab = jax.random.split(key, 6)

    # Synthetic BERT-pooled features (stand-in for encoder_pi(...)[1]), T tasks at once.
    support_feats = jax.random.normal(k_fs, (NUM_TASKS, B_SUP, HIDDEN), dtype=jnp.float32)
    query_feats = jax.random.normal(k_fq, (NUM_TASKS, B_QRY, HIDDEN), dtype=jnp.float32)

    # Head parameters (nn.Linear(H, 256) and nn.Linear(H, 257)), pre-transposed to [in, out].
    w_lin_t = 0.02 * jax.random.normal(k_wl, (HIDDEN, EMB), dtype=jnp.float32)
    b_lin = 0.02 * jax.random.normal(k_bl, (1, EMB), dtype=jnp.float32)
    w_lab_t = 0.02 * jax.random.normal(k_wlab, (HIDDEN, LAB), dtype=jnp.float32)
    b_lab = 0.02 * jax.random.normal(k_blab, (1, LAB), dtype=jnp.float32)

    base_sup = jnp.array([0, 0, 1, 1, 2, 2, 3, 3], dtype=jnp.int32)
    base_qry = jnp.array([0, 1, 2, 3, 0, 1, 2, 3], dtype=jnp.int32)
    support_labels = jnp.stack([jnp.roll(base_sup, t) for t in range(NUM_TASKS)])
    query_labels = jnp.stack([jnp.roll(base_qry, t) for t in range(NUM_TASKS)])

    logits, loss, acc = leopard_head(
        support_feats, query_feats, w_lin_t, b_lin, w_lab_t, b_lab,
        support_labels, query_labels, num_classes=NUM_CLASSES)
    jax.block_until_ready((logits, loss, acc))

    with jax.default_matmul_precision("highest"):
        ref_fn = jax.vmap(
            functools.partial(_reference_single, num_classes=NUM_CLASSES),
            in_axes=(0, 0, None, None, None, None, 0, 0))
        ref_logits, ref_loss, ref_acc = ref_fn(
            support_feats, query_feats, w_lin_t, b_lin, w_lab_t, b_lab,
            support_labels, query_labels)

    assert jnp.allclose(logits, ref_logits, rtol=1e-4, atol=1e-5), "logits mismatch"
    assert jnp.allclose(loss, ref_loss, rtol=1e-4, atol=1e-5), "loss mismatch"
    assert jnp.allclose(acc, ref_acc, rtol=1e-4, atol=1e-5), "acc mismatch"

    print("KERNEL_OK")
</pallas_src>

<mosaic_0001>
module attributes {stable_mosaic.version = 11 : i64} {
  func.func @_leopard_task_kernel(%arg0: i32, %arg1: memref<1x16x32xf32, #tpu.memory_space<vmem>>, %arg2: memref<32x512xf32, #tpu.memory_space<vmem>>, %arg3: memref<1x512xf32, #tpu.memory_space<vmem>>, %arg4: memref<1x32xf32, #tpu.memory_space<vmem>>, %arg5: memref<1x1xf32, #tpu.memory_space<vmem>>, %arg6: memref<1x8x128xf32, #tpu.memory_space<vmem>>, %arg7: memref<1x8x128xf32, #tpu.memory_space<vmem>>, %arg8: memref<1x8x128xf32, #tpu.memory_space<vmem>>, %arg9: memref<1x1x128xf32, #tpu.memory_space<vmem>>) attributes {dimension_semantics = [#tpu.dimension_semantics<parallel>], iteration_bounds = array<i64: 4>, scalar_prefetch = 0 : i64, scratch_operands = 0 : i64, tpu.core_type = #tpu.core_type<tc>, window_params = [{transform_indices = @transform_0, window_bounds = array<i64: 1, 16, 32>}, {pipeline_mode = #tpu.pipeline_mode<synchronous>, transform_indices = @transform_1, window_bounds = array<i64: 32, 512>}, {pipeline_mode = #tpu.pipeline_mode<synchronous>, transform_indices = @transform_2, window_bounds = array<i64: 1, 512>}, {pipeline_mode = #tpu.pipeline_mode<synchronous>, transform_indices = @transform_3, window_bounds = array<i64: 1, 32>}, {pipeline_mode = #tpu.pipeline_mode<synchronous>, transform_indices = @transform_4, window_bounds = array<i64: 1, 1>}, {transform_indices = @transform_5, window_bounds = array<i64: 1, 8, 128>}, {transform_indices = @transform_6, window_bounds = array<i64: 1, 8, 128>}, {transform_indices = @transform_7, window_bounds = array<i64: 1, 8, 128>}, {transform_indices = @transform_8, window_bounds = array<i64: 1, 1, 128>}]} {
    %c0 = arith.constant 0 : index
    %c0_0 = arith.constant 0 : index
    %c0_1 = arith.constant 0 : index
    %0 = vector.load %arg1[%c0, %c0_0, %c0_1] : memref<1x16x32xf32, #tpu.memory_space<vmem>>, vector<1x16x32xf32>
    %1 = vector.shape_cast %0 : vector<1x16x32xf32> to vector<16x32xf32>
    %c0_2 = arith.constant 0 : index
    %c0_3 = arith.constant 0 : index
    %2 = vector.load %arg2[%c0_2, %c0_3] : memref<32x512xf32, #tpu.memory_space<vmem>>, vector<32x512xf32>
    %cst = arith.constant dense<0.000000e+00> : vector<16x512xf32>
    %3 = tpu.matmul %1, %2, %cst {dimension_numbers = #tpu.dot_dimension_numbers<[1], [0], [0], [1], [0, 0, 1, 1], [], []>} : vector<16x32xf32>, vector<32x512xf32>, vector<16x512xf32> -> vector<16x512xf32>
    %c0_4 = arith.constant 0 : index
    %c0_5 = arith.constant 0 : index
    %4 = vector.load %arg3[%c0_4, %c0_5] : memref<1x512xf32, #tpu.memory_space<vmem>>, vector<1x512xf32>
    %5 = vector.broadcast %4 : vector<1x512xf32> to vector<16x512xf32>
    %6 = arith.addf %3, %5 : vector<16x512xf32>
    %7 = vector.extract_strided_slice %6 {offsets = [0, 256], sizes = [8, 256], strides = [1, 1]} : vector<16x512xf32> to vector<8x256xf32>
    %8 = vector.extract_strided_slice %6 {offsets = [8, 0], sizes = [8, 256], strides = [1, 1]} : vector<16x512xf32> to vector<8x256xf32>
    %9 = vector.extract_strided_slice %1 {offsets = [0, 0], sizes = [8, 32], strides = [1, 1]} : vector<16x32xf32> to vector<8x32xf32>
    %c0_6 = arith.constant 0 : index
    %c0_7 = arith.constant 0 : index
    %10 = vector.load %arg4[%c0_6, %c0_7] : memref<1x32xf32, #tpu.memory_space<vmem>>, vector<1x32xf32>
    %11 = vector.broadcast %10 : vector<1x32xf32> to vector<8x32xf32>
    %12 = arith.mulf %9, %11 : vector<8x32xf32>
    %cst_8 = arith.constant dense<0.000000e+00> : vector<8xf32>
    %13 = vector.multi_reduction <add>, %12, %cst_8 [1] : vector<8x32xf32> to vector<8xf32>
    %14 = vector.shape_cast %13 : vector<8xf32> to vector<8x1xf32>
    %c0_9 = arith.constant 0 : index
    %c0_10 = arith.constant 0 : index
    %15 = vector.load %arg5[%c0_9, %c0_10] : memref<1x1xf32, #tpu.memory_space<vmem>>, vector<1x1xf32>
    %16 = vector.broadcast %15 : vector<1x1xf32> to vector<8x1xf32>
    %17 = arith.addf %14, %16 : vector<8x1xf32>
    %c0_11 = arith.constant 0 : index
    %c0_12 = arith.constant 0 : index
    %c0_13 = arith.constant 0 : index
    %18 = vector.load %arg6[%c0_11, %c0_12, %c0_13] : memref<1x8x128xf32, #tpu.memory_space<vmem>>, vector<1x8x128xf32>
    %19 = vector.shape_cast %18 : vector<1x8x128xf32> to vector<8x128xf32>
    %cst_14 = arith.constant dense<0.000000e+00> : vector<8x8xf32>
    %20 = tpu.matmul %8, %7, %cst_14 {dimension_numbers = #tpu.dot_dimension_numbers<[1], [1], [0], [0], [0, 0, 1, 0], [], []>} : vector<8x256xf32>, vector<8x256xf32>, vector<8x8xf32> -> vector<8x8xf32>
    %21 = vector.broadcast %17 : vector<8x1xf32> to vector<8x128xf32>
    %22 = arith.mulf %19, %21 : vector<8x128xf32>
    %cst_15 = arith.constant dense<0.000000e+00> : vector<128xf32>
    %23 = vector.multi_reduction <add>, %22, %cst_15 [0] : vector<8x128xf32> to vector<128xf32>
    %24 = vector.shape_cast %23 : vector<128xf32> to vector<1x128xf32>
    %cst_16 = arith.constant dense<0.000000e+00> : vector<8x128xf32>
    %25 = tpu.matmul %20, %19, %cst_16 {dimension_numbers = #tpu.dot_dimension_numbers<[1], [0], [0], [1], [0, 0, 1, 1], [], []>} : vector<8x8xf32>, vector<8x128xf32>, vector<8x128xf32> -> vector<8x128xf32>
    %26 = vector.broadcast %24 : vector<1x128xf32> to vector<8x128xf32>
    %27 = arith.addf %25, %26 : vector<8x128xf32>
    %c0_17 = arith.constant 0 : index
    %c0_18 = arith.constant 0 : index
    %c0_19 = arith.constant 0 : index
    %28 = vector.load %arg8[%c0_17, %c0_18, %c0_19] : memref<1x8x128xf32, #tpu.memory_space<vmem>>, vector<1x8x128xf32>
    %29 = vector.shape_cast %28 : vector<1x8x128xf32> to vector<8x128xf32>
    %30 = vector.shape_cast %27 : vector<8x128xf32> to vector<1x8x128xf32>
    tpu.vector_store %arg8[%c0_17, %c0_18, %c0_19], %30 {strides = array<i32>} : memref<1x8x128xf32, #tpu.memory_space<vmem>>, vector<1x8x128xf32>,
    %c0_20 = arith.constant 0 : index
    %c0_21 = arith.constant 0 : index
    %c0_22 = arith.constant 0 : index
    %31 = vector.load %arg7[%c0_20, %c0_21, %c0_22] : memref<1x8x128xf32, #tpu.memory_space<vmem>>, vector<1x8x128xf32>
    %32 = vector.shape_cast %31 : vector<1x8x128xf32> to vector<8x128xf32>
    %33 = tpu.iota {dimensions = array<i32: 1>} : vector<8x128xi32>
    %c4_i32 = arith.constant 4 : i32
    %34 = vector.broadcast %c4_i32 : i32 to vector<8x128xi32>
    %35 = arith.cmpi slt, %33, %34 : vector<8x128xi32>
    %cst_23 = arith.constant -1.000000e+30 : f32
    %36 = vector.broadcast %cst_23 : f32 to vector<8x128xf32>
    %37 = arith.select %35, %27, %36 : vector<8x128xi1>, vector<8x128xf32>
    %cst_24 = arith.constant dense<0xFF800000> : vector<8xf32>
    %38 = vector.multi_reduction <maximumf>, %37, %cst_24 [1] : vector<8x128xf32> to vector<8xf32>
    %39 = vector.shape_cast %38 : vector<8xf32> to vector<8x1xf32>
    %40 = vector.broadcast %39 : vector<8x1xf32> to vector<8x128xf32>
    %41 = arith.subf %37, %40 : vector<8x128xf32>
    %42 = math.exp %41 : vector<8x128xf32>
    %cst_25 = arith.constant dense<0.000000e+00> : vector<8xf32>
    %43 = vector.multi_reduction <add>, %42, %cst_25 [1] : vector<8x128xf32> to vector<8xf32>
    %44 = vector.shape_cast %43 : vector<8xf32> to vector<8x1xf32>
    %45 = math.log %44 : vector<8x1xf32>
    %46 = arith.addf %45, %39 : vector<8x1xf32>
    %47 = arith.mulf %32, %27 : vector<8x128xf32>
    %cst_26 = arith.constant dense<0.000000e+00> : vector<8xf32>
    %48 = vector.multi_reduction <add>, %47, %cst_26 [1] : vector<8x128xf32> to vector<8xf32>
    %49 = vector.shape_cast %48 : vector<8xf32> to vector<8x1xf32>
    %50 = arith.subf %46, %49 : vector<8x1xf32>
    %cst_27 = arith.constant dense<0.000000e+00> : vector<1xf32>
    %51 = vector.multi_reduction <add>, %50, %cst_27 [0] : vector<8x1xf32> to vector<1xf32>
    %52 = vector.shape_cast %51 : vector<1xf32> to vector<1x1xf32>
    %cst_28 = arith.constant 1.250000e-01 : f32
    %53 = vector.broadcast %cst_28 : f32 to vector<1x1xf32>
    %54 = arith.mulf %52, %53 : vector<1x1xf32>
    %55 = vector.broadcast %39 : vector<8x1xf32> to vector<8x128xf32>
    %56 = arith.cmpf oge, %37, %55 : vector<8x128xf32>
    %c128_i32 = arith.constant 128 : i32
    %57 = vector.broadcast %c128_i32 : i32 to vector<8x128xi32>
    %58 = arith.select %56, %33, %57 : vector<8x128xi1>, vector<8x128xi32>
    %cst_29 = arith.constant dense<2147483647> : vector<8xi32>
    %59 = vector.multi_reduction <minsi>, %58, %cst_29 [1] : vector<8x128xi32> to vector<8xi32>
    %60 = vector.shape_cast %59 : vector<8xi32> to vector<8x1xi32>
    %cst_30 = arith.constant 5.000000e-01 : f32
    %61 = vector.broadcast %cst_30 : f32 to vector<8x128xf32>
    %62 = arith.cmpf ogt, %32, %61 : vector<8x128xf32>
    %c128_i32_31 = arith.constant 128 : i32
    %63 = vector.broadcast %c128_i32_31 : i32 to vector<8x128xi32>
    %64 = arith.select %62, %33, %63 : vector<8x128xi1>, vector<8x128xi32>
    %cst_32 = arith.constant dense<2147483647> : vector<8xi32>
    %65 = vector.multi_reduction <minsi>, %64, %cst_32 [1] : vector<8x128xi32> to vector<8xi32>
    %66 = vector.shape_cast %65 : vector<8xi32> to vector<8x1xi32>
    %67 = arith.cmpi eq, %60, %66 : vector<8x1xi32>
    %68 = arith.extui %67 : vector<8x1xi1> to vector<8x1xi32>
    %69 = arith.sitofp %68 : vector<8x1xi32> to vector<8x1xf32>
    %cst_33 = arith.constant dense<0.000000e+00> : vector<1xf32>
    %70 = vector.multi_reduction <add>, %69, %cst_33 [0] : vector<8x1xf32> to vector<1xf32>
    %71 = vector.shape_cast %70 : vector<1xf32> to vector<1x1xf32>
    %cst_34 = arith.constant 1.250000e-01 : f32
    %72 = vector.broadcast %cst_34 : f32 to vector<1x1xf32>
    %73 = arith.mulf %71, %72 : vector<1x1xf32>
    %74 = tpu.iota {dimensions = array<i32: 1>} : vector<1x128xi32>
    %c0_i32 = arith.constant 0 : i32
    %75 = vector.broadcast %c0_i32 : i32 to vector<1x128xi32>
    %76 = arith.cmpi eq, %74, %75 : vector<1x128xi32>
    %c1_i32 = arith.constant 1 : i32
    %77 = vector.broadcast %c1_i32 : i32 to vector<1x128xi32>
    %78 = arith.cmpi eq, %74, %77 : vector<1x128xi32>
    %cst_35 = arith.constant 0.000000e+00 : f32
    %79 = vector.broadcast %cst_35 : f32 to vector<1x1xf32>
    %80 = vector.shape_cast %73 : vector<1x1xf32> to vector<1x1xf32>
    %81 = vector.broadcast %80 : vector<1x1xf32> to vector<1x128xf32>
    %82 = vector.shape_cast %79 : vector<1x1xf32> to vector<1x1xf32>
    %83 = vector.broadcast %82 : vector<1x1xf32> to vector<1x128xf32>
    %84 = arith.select %78, %81, %83 : vector<1x128xi1>, vector<1x128xf32>
    %85 = vector.shape_cast %54 : vector<1x1xf32> to vector<1x1xf32>
    %86 = vector.broadcast %85 : vector<1x1xf32> to vector<1x128xf32>
    %87 = arith.select %76, %86, %84 : vector<1x128xi1>, vector<1x128xf32>
    %c0_36 = arith.constant 0 : index
    %c0_37 = arith.constant 0 : index
    %c0_38 = arith.constant 0 : index
    %88 = vector.load %arg9[%c0_36, %c0_37, %c0_38] : memref<1x1x128xf32, #tpu.memory_space<vmem>>, vector<1x1x128xf32>
    %89 = vector.shape_cast %88 : vector<1x1x128xf32> to vector<1x128xf32>
    %90 = vector.shape_cast %87 : vector<1x128xf32> to vector<1x1x128xf32>
    tpu.vector_store %arg9[%c0_36, %c0_37, %c0_38], %90 {strides = array<i32>} : memref<1x1x128xf32, #tpu.memory_space<vmem>>, vector<1x1x128xf32>,
    return
  }
  func.func @transform_0(%arg0: i32) -> (i32, i32, i32) {
    %c0_i32 = arith.constant 0 : i32
    %c0_i32_0 = arith.constant 0 : i32
    %c0_i32_1 = arith.constant 0 : i32
    return %arg0, %c0_i32, %c0_i32_0 : i32, i32, i32
  }
  func.func @transform_1(%arg0: i32) -> (i32, i32) {
    %c0_i32 = arith.constant 0 : i32
    %c0_i32_0 = arith.constant 0 : i32
    %c0_i32_1 = arith.constant 0 : i32
    return %c0_i32, %c0_i32_0 : i32, i32
  }
  func.func @transform_2(%arg0: i32) -> (i32, i32) {
    %c0_i32 = arith.constant 0 : i32
    %c0_i32_0 = arith.constant 0 : i32
    %c0_i32_1 = arith.constant 0 : i32
    return %c0_i32, %c0_i32_0 : i32, i32
  }
  func.func @transform_3(%arg0: i32) -> (i32, i32) {
    %c0_i32 = arith.constant 0 : i32
    %c0_i32_0 = arith.constant 0 : i32
    %c0_i32_1 = arith.constant 0 : i32
    return %c0_i32, %c0_i32_0 : i32, i32
  }
  func.func @transform_4(%arg0: i32) -> (i32, i32) {
    %c0_i32 = arith.constant 0 : i32
    %c0_i32_0 = arith.constant 0 : i32
    %c0_i32_1 = arith.constant 0 : i32
    return %c0_i32, %c0_i32_0 : i32, i32
  }
  func.func @transform_5(%arg0: i32) -> (i32, i32, i32) {
    %c0_i32 = arith.constant 0 : i32
    %c0_i32_0 = arith.constant 0 : i32
    %c0_i32_1 = arith.constant 0 : i32
    return %arg0, %c0_i32, %c0_i32_0 : i32, i32, i32
  }
  func.func @transform_6(%arg0: i32) -> (i32, i32, i32) {
    %c0_i32 = arith.constant 0 : i32
    %c0_i32_0 = arith.constant 0 : i32
    %c0_i32_1 = arith.constant 0 : i32
    return %arg0, %c0_i32, %c0_i32_0 : i32, i32, i32
  }
  func.func @transform_7(%arg0: i32) -> (i32, i32, i32) {
    %c0_i32 = arith.constant 0 : i32
    %c0_i32_0 = arith.constant 0 : i32
    %c0_i32_1 = arith.constant 0 : i32
    return %arg0, %c0_i32, %c0_i32_0 : i32, i32, i32
  }
  func.func @transform_8(%arg0: i32) -> (i32, i32, i32) {
    %c0_i32 = arith.constant 0 : i32
    %c0_i32_0 = arith.constant 0 : i32
    %c0_i32_1 = arith.constant 0 : i32
    return %arg0, %c0_i32, %c0_i32_0 : i32, i32, i32
  }
}

</mosaic_0001>

<bundles_post_ra>
// kernel: leopard_head.1
= control target key start
LH: loop header
LB: loop body
LE: loop exit
PB: predicated region body
PF: predicated region fallthrough
CT: control target
= control target key end

     0   :  { %s1017_s29 = smov 0   ;;  %s1121_s0 = inlined_call_operand.vmem [shape: f32[4,16,32], index: 0, kind: input, shape index: {}]   ;;  %s1122_s1 = inlined_call_operand.vmem [shape: f32[32,512], index: 1, kind: input, shape index: {}]   ;;  %s1123_s2 = inlined_call_operand.vmem [shape: f32[1,512], index: 2, kind: input, shape index: {}]   ;;  %s1124_s3 = inlined_call_operand.vmem [shape: f32[1,32], index: 3, kind: input, shape index: {}]   ;;  %s1125_s4 = inlined_call_operand.<no memory space> [shape: f32[1,1], index: 4, kind: input, shape index: {}]   ;;  %s1126_s5 = inlined_call_operand.vmem [shape: f32[4,8,128], index: 5, kind: input, shape index: {}]   ;;  %s1127_s6 = inlined_call_operand.vmem [shape: f32[4,8,128], index: 6, kind: input, shape index: {}]   ;;  %s1128_s7 = inlined_call_operand.vmem [shape: f32[4,8,128], index: 7, kind: output, shape index: {0}]   ;;  %s1129_s8 = inlined_call_operand.vmem [shape: f32[4,1,128], index: 8, kind: output, shape index: {1}]  }
   0x1   :  { %v14_v0 = vstv %s1125_s4 }
   0x2   :  { %15 = vst [vmem:[#allocation2] sm:$0x1] %v14_v0 }
   0x3 LB: > { %s898_s30 = sadd.s32 4294967295, %s964_s29   ;;  %p902_p0 = scmp.ge.s32.totalorder %s964_s29, 1  ;;  %s964_s29 = sphi %s1017_s29, %s21_s29  }
   0x4   : > { %p285_p1 = scmp.lt.s32.totalorder %s964_s29, 5 }
   0x6   : > { %p286_p2 = pnand %p902_p0, %p285_p1 }
   0x7   : > { %v352_v1 = vld [vmem:[%s1122_s1 + $0x8] sm:$0xff] (!%p286_p2)  ;;  %v354_v3 = vld [vmem:[%s1122_s1 + $0x18] sm:$0xff] (!%p286_p2)  ;;  %p329_p3 = scmp.lt.s32.totalorder (!%p286_p2), %s898_s30, 3  ;;  %v351_v6 = vld [vmem:[%s1122_s1] sm:$0xff] (!%p286_p2)  ;;  %v966_v8 = vmov (!%p286_p2), 0.0   ;;  %vm389_vm0 = vcmask (!%p286_p2), 261120   ;;  %v369_v32 = vlaneseq (!%p286_p2) }
   0x8   : > { %289 = sbr.rel (%p286_p2) target bundleno = 1127 (0x467), region = 48  ;;  %v356_v2 = vld [vmem:[%s1122_s1 + $0x28] sm:$0xff] (!%p286_p2)  ;;  %v358_v5 = vld [vmem:[%s1122_s1 + $0x38] sm:$0xff] (!%p286_p2)  ;;  %v355_v7 = vld [vmem:[%s1122_s1 + $0x20] sm:$0xff] (!%p286_p2)  ;;  %460 = vmatprep.mubr.f32.mxu0 (!%p286_p2), %v966_v8  ;;  %535 = vmatprep.mubr.f32.mxu1 (!%p286_p2), %v966_v8  ;;  %vm967_vm1 = vmmov (!%p286_p2), 0   ;;  %v968_v58 = vmov (!%p286_p2), 0  }
   0x9   : > { %v926_v4 = vpack.c.bf16 (!%p286_p2), %v356_v2, %v352_v1  ;;  %v934_v9 = vpack.c.bf16 (!%p286_p2), %v358_v5, %v354_v3  ;;  %v928_v10 = vpack.c.bf16 (!%p286_p2), %v355_v7, %v351_v6  ;;  %v353_v11 = vld [vmem:[%s1122_s1 + $0x10] sm:$0xff] (!%p286_p2)  ;;  %v360_v13 = vld [vmem:[%s1122_s1 + $0x48] sm:$0xff] (!%p286_p2)  ;;  %v362_v16 = vld [vmem:[%s1122_s1 + $0x58] sm:$0xff] (!%p286_p2)  ;;  %v370_v33 = vshrl.u32 (!%p286_p2), %v369_v32, 7  ;;  %953 = vset.pattern.permute.xlu0 (!%p286_p2), %v968_v58 }
   0xa   : > { %v357_v12 = vld [vmem:[%s1122_s1 + $0x30] sm:$0xff] (!%p286_p2)  ;;  %v364_v15 = vld [vmem:[%s1122_s1 + $0x68] sm:$0xff] (!%p286_p2)  ;;  %v366_v17 = vld [vmem:[%s1122_s1 + $0x78] sm:$0xff] (!%p286_p2)  ;;  %vm648_vm2 = vcmask (!%p286_p2), 64512  }
   0xb   : > { %927 = vmatprep.subr.bf16.mxu0 (!%p286_p2), %v926_v4  ;;  %v936_v14 = vpack.c.bf16 (!%p286_p2), %v357_v12, %v353_v11  ;;  %935 = vmatprep.subr.bf16.mxu1 (!%p286_p2), %v934_v9  ;;  %v930_v18 = vpack.c.bf16 (!%p286_p2), %v364_v15, %v360_v13  ;;  %v938_v19 = vpack.c.bf16 (!%p286_p2), %v366_v17, %v362_v16  ;;  %v359_v20 = vld [vmem:[%s1122_s1 + $0x40] sm:$0xff] (!%p286_p2)  ;;  %v361_v22 = vld [vmem:[%s1122_s1 + $0x50] sm:$0xff] (!%p286_p2)  ;;  %v379_v34 = vsub.s32 (!%p286_p2), 2, %v370_v33 }
   0xc   : > { %929 = vmatpush1.bf16.msra.mxu0 (!%p286_p2), %v928_v10  ;;  %v363_v21 = vld [vmem:[%s1122_s1 + $0x60] sm:$0xff] (!%p286_p2)  ;;  %v365_v24 = vld [vmem:[%s1122_s1 + $0x70] sm:$0xff] (!%p286_p2)  ;;  %v383_v36 = vsub.s32 (!%p286_p2), 3, %v370_v33  ;;  %v375_v38 = vsub.s32 (!%p286_p2), 1, %v370_v33  ;;  %v371_v40 = vsub.s32 (!%p286_p2), 0, %v370_v33  ;;  %v1098_v4 = vand.u32 (!%p286_p2), 127, %v369_v32 }
   0xd   : > { %937 = vmatpush1.bf16.msra.mxu1 (!%p286_p2), %v936_v14  ;;  %v932_v23 = vpack.c.bf16 (!%p286_p2), %v363_v21, %v359_v20  ;;  %931 = vmatprep.subr.bf16.mxu0 (!%p286_p2), %v930_v18  ;;  %v940_v25 = vpack.c.bf16 (!%p286_p2), %v365_v24, %v361_v22  ;;  %v912_v28 = vld [vmem:[%s1124_s3] ss:$0 sm:$0xff] (!%p286_p2) }
   0xe   : > { %939 = vmatprep.subr.bf16.mxu1 (!%p286_p2), %v938_v19  ;;  %v367_v35 = vld [vmem:[%s1123_s2] sm:$0xf] (!%p286_p2)  ;;  %vm726_vm3 = vcmp.lt.s32.totalorder (!%p286_p2), %v1098_v4, 4  ;;  %vm792_vm9 = vcmp.eq.s32.totalorder (!%p286_p2), %v1098_v4, 1  ;;  %vm791_vm10 = vcmp.eq.s32.totalorder (!%p286_p2), %v1098_v4, 0 }
   0xf   : > { %s1131_s30 = smov (!%p329_p3, %s898_s30), 3  ;;  %v380_v37 = vrot.slane %v367_v35, %v379_v34  ;;  %v384_v39 = vrot.slane %v367_v35, %v383_v36  ;;  %v376_v46 = vrot.slane %v367_v35, %v375_v38  ;;  %v372_v48 = vrot.slane %v367_v35, %v371_v40  ;;  %v913_v55 = vld [vmem:[#allocation2] ss:$0 sm:$0xff] }
  0x10   : > { %s918_s17 = sshll.u32 %s1131_s30, 4  ;;  %933 = vmatpush1.bf16.msra.mxu0 %v932_v23  ;;  %s1088_s25 = sshll.u32 %s1131_s30, 3 }
  0x11   : > { %s333_s22 = scalar_lea.vmem %s1121_s0, %s918_s17  ;;  %941 = vmatpush1.bf16.msra.mxu1 %v940_v25  ;;  %s337_s28 = scalar_lea.vmem %s1126_s5, %s1088_s25 }
  0x12   : > { %v349_v26 = vld [vmem:[%s333_s22] sm:$0xff]  ;;  %921 = vmatprep.subr.mxu1 %v966_v8  ;;  %v350_v27 = vld [vmem:[%s333_s22 + $0x8] sm:$0xff]  ;;  %s341_s12 = scalar_lea.vmem %s1127_s6, %s1088_s25  ;;  %s345_s15 = scalar_lea.vmem %s1128_s7, %s1088_s25 }
  0x13   : > { %908 = vmatmul.mubr.msk.f32.vlgmr.msra.gmra.mrb[0].mxu0 %vm389_vm0, %v349_v26  ;;  %v553_v29 = vmul.f32 %v912_v28, %v349_v26  ;;  %v565_v30 = vld [vmem:[%s337_s28] sm:$0xff]  ;;  %s348_s18 = scalar_lea.vmem %s1129_s8, %s1131_s30 }
  0x14   : > { %910 = vmatmul.mubr.msk.f32.vlgmr.msra.gmra.mrb[0].mxu1 %vm389_vm0, %v349_v26  ;;  %464 = vmatprep.mubr.f32.mxu0 %v966_v8  ;;  %v723_v7 = vld [vmem:[%s341_s12] sm:$0xff] }
  0x15   : > { %541 = vmatprep.mubr.f32.mxu1 %v966_v8  ;;  %v554_v31 = vsel %vm389_vm0, %v553_v29, 0.0  ;;  %922 = vmatpush3.msra.mxu1 %v565_v30  ;;  %vm765_vm4 = vcmp.gt.f32.partialorder %v723_v7, 0.5 }
  0x16   : > { %555 = vadd.xlane.f32.xlu0 %v554_v31  ;;  %v766_v14 = vsel %vm765_vm4, %v1098_v4, 128 }
  0x17   : > { %909 = vmatmul.mubr.msk.f32.gmra.mrb[2].mxu0 %vm389_vm0, %v350_v27  ;;  %v768_v19 = vshra.s32 %v766_v14, 16  ;;  %v767_v24 = vand.u32 65535, %v766_v14 }
  0x18   : > { %911 = vmatmul.mubr.msk.f32.gmra.mrb[2].mxu1 %vm389_vm0, %v350_v27 }
  0x19   : > { %923 = vmatprep.mubr.msk.f32.mxu1 %vm967_vm1, %v966_v8  ;;  %v770_v21 = vcvt.s32.f32 %v768_v19  ;;  %v769_v28 = vcvt.s32.f32 %v767_v24 }
  0xa3   : > { %v556_v56 = vpop.xlane.xlu0 %555 }
  0xa4   : > { %v564_v57 = vadd.f32 %v913_v55, %v556_v56 }
  0xa6   : > { %638 = vperm.xlu0 %953, %v564_v57  }
  0xe6   : > { %v462_v41 = vpop.f32.mrb[0].mxu0 }
  0xe7   : > { %v537_v42 = vpop.f32.mrb[0].mxu1  ;;  %v463_v43 = vpop.f32.mrb[1].mxu0 }
  0xe8   : > { %v538_v44 = vadd.f32 %v537_v42, %v380_v37  ;;  %v539_v45 = vpop.f32.mrb[1].mxu1 }
  0xe9   : > { %v540_v47 = vadd.f32 %v539_v45, %v384_v39 }
  0xea   : > { %v466_v49 = vpop.f32.mrb[2].mxu0 }
  0xeb   : > { %566 = vmatprep.subr.mxu0 %v540_v47  ;;  %v468_v50 = vpop.f32.mrb[3].mxu0  ;;  %v543_v51 = vpop.f32.mrb[2].mxu1  ;;  %v467_v54 = vadd.f32 %v466_v49, %v372_v48 }
  0xec   : > { %v469_v52 = vadd.f32 %v468_v50, %v376_v46  ;;  %567 = vmatpush1.xpose.msra.mxu0 %v538_v44  ;;  %v544_v53 = vpop.f32.mrb[3].mxu1 }
  0xee   : > { %630 = vmatprep.mubr.f32.mxu0 %v469_v52 }
  0xef   : > { %631 = vmatmul.mubr.f32.vlgmr.msra.gmra.mrb[4].mxu0 %v467_v54 }
 0x125   : > { %v639_v61 = vpop.permute.xlu0 %638 }
 0x126   : > { %v641_v62 = vmul.f32 %v639_v61, %v565_v30 }
 0x128   : > { %v642_v63 = vrot.slane %v641_v62, 4 }
 0x12a   : > { %v643_v0 = vadd.f32 %v642_v63, %v641_v62 }
 0x12c   : > { %v644_v1 = vrot.slane %v643_v0, 2 }
 0x12e   : > { %v645_v2 = vadd.f32 %v644_v1, %v643_v0 }
 0x130   : > { %v646_v3 = vrot.slane %v645_v2, 1 }
 0x132   : > { %v647_v5 = vadd.f32 %v646_v3, %v645_v2 }
 0x1c2   : > { %v632_v59 = vpop.f32.mrb[4].mxu0 }
 0x1c3   : > { %924 = vmatmul.mubr.msk.f32.vlgmr.msra.gmra.mrb[4].mxu1 %vm648_vm2, %v632_v59  ;;  %v634_v60 = vpop.f32.mrb[5].mxu0 }
 0x296   : > { %v718_v6 = vpop.f32.mrb[4].mxu1 }
 0x297   : > { %v719_v9 = vadd.f32 %v718_v6, %v647_v5  ;;  %v925_v10 = vpop.f32.mrb[5].mxu1 }
 0x299   : > { %722 = vst [vmem:[%s345_s15] sm:$0xff] %v719_v9  ;;  %v727_v11 = vsel %vm726_vm3, %v719_v9, -1e+30  ;;  %v738_v12 = vmul.f32 %v723_v7, %v719_v9 }
 0x29a   : > { %728 = vmax.xlane.f32.xlu1 %v727_v11 }
 0x327   : > { %v729_v13 = vpop.xlane.xlu1 %728 }
 0x328   : > { %v730_v15 = vsub.f32 %v727_v11, %v729_v13  ;;  %vm749_vm5 = vcmp.ge.f32.partialorder %v727_v11, %v729_v13 }
 0x329   : > { %v750_v16 = vsel %vm749_vm5, %v1098_v4, 128 }
 0x32a   : > { %v731_v17 = vmul.f32 1.442695, %v730_v15  ;;  %v752_v18 = vshra.s32 %v750_v16, 16  ;;  %v751_v23 = vand.u32 65535, %v750_v16 }
 0x32c   : > { %954 = vpow2.f32 %v731_v17  ;;  %v754_v20 = vcvt.s32.f32 %v752_v18  ;;  %v753_v26 = vcvt.s32.f32 %v751_v23 }
 0x32e   : > { %755 = vmin.xlane.f32.xlu1 %v754_v20 }
 0x332   : > { %771 = vmin.xlane.f32.xlu1 %v770_v21 }
 0x336   : > { %v955_v22 = vpop.eup %954 }
 0x337   : > { %733 = vadd.xlane.f32.xlu1 %v955_v22 }
 0x3bb   : > { %v756_v25 = vpop.xlane.xlu1 %755 }
 0x3bc   : > { %vm757_vm6 = vcmp.eq.f32.partialorder %v754_v20, %v756_v25  ;;  %v762_v34 = vcvt.f32.s32 %v756_v25 }
 0x3bd   : > { %v758_v27 = vsel %vm757_vm6, %v753_v26, inf }
 0x3be   : > { %759 = vmin.xlane.f32.xlu1 %v758_v27  ;;  %v763_v39 = vshll.u32 %v762_v34, 16 }
 0x3bf   : > { %v772_v29 = vpop.xlane.xlu1 %771 }
 0x3c0   : > { %vm773_vm7 = vcmp.eq.f32.partialorder %v770_v21, %v772_v29  ;;  %v778_v35 = vcvt.f32.s32 %v772_v29 }
 0x3c1   : > { %v774_v30 = vsel %vm773_vm7, %v769_v28, inf }
 0x3c2   : > { %775 = vmin.xlane.f32.xlu1 %v774_v30  ;;  %v779_v40 = vshll.u32 %v778_v35, 16 }
 0x3c4   : > { %v734_v31 = vpop.xlane.xlu1 %733 }
 0x3c5   : > { %956 = vlog2.f32 %v734_v31 }
 0x3c6   : > { %739 = vadd.xlane.f32.xlu1 %v738_v12 }
 0x3cf   : > { %v957_v32 = vpop.eup %956 }
 0x3d0   : > { %v736_v36 = vmul.f32 0.6931472, %v957_v32 }
 0x3d2   : > { %v737_v44 = vadd.f32 %v736_v36, %v729_v13 }
 0x44b   : > { %v760_v33 = vpop.xlane.xlu1 %759 }
 0x44c   : > { %v761_v37 = vcvt.f32.s32 %v760_v33 }
 0x44e   : > { %v764_v42 = vadd.s32 %v763_v39, %v761_v37 }
 0x44f   : > { %v776_v38 = vpop.xlane.xlu1 %775 }
 0x450   : > { %v777_v41 = vcvt.f32.s32 %v776_v38 }
 0x452   : > { %v780_v43 = vadd.s32 %v779_v40, %v777_v41 }
 0x453   : > { %v740_v45 = vpop.xlane.xlu1 %739 }
 0x454   : > { %vm781_vm8 = vcmp.eq.s32.totalorder %v764_v42, %v780_v43  ;;  %v741_v46 = vsub.f32 %v737_v44, %v740_v45 }
 0x455   : > { %v915_v47 = vsel %vm781_vm8, 1.0, %v966_v8 }
 0x456   : > { %v784_v48 = vrot.slane %v915_v47, 4  ;;  %v742_v49 = vrot.slane %v741_v46, 4 }
 0x458   : > { %v785_v50 = vadd.f32 %v915_v47, %v784_v48  ;;  %v743_v51 = vadd.f32 %v742_v49, %v741_v46 }
 0x45a   : > { %v786_v52 = vrot.slane %v785_v50, 2  ;;  %v744_v53 = vrot.slane %v743_v51, 2 }
 0x45c   : > { %v787_v54 = vadd.f32 %v786_v52, %v785_v50  ;;  %v745_v55 = vadd.f32 %v744_v53, %v743_v51 }
 0x45e   : > { %v788_v56 = vrot.slane %v787_v54, 1  ;;  %v746_v57 = vrot.slane %v745_v55, 1 }
 0x460   : > { %v789_v58 = vadd.f32 %v788_v56, %v787_v54  ;;  %v747_v59 = vadd.f32 %v746_v57, %v745_v55 }
 0x462   : > { %v790_v60 = vmul.f32 0.125, %v789_v58  ;;  %v748_v61 = vmul.f32 0.125, %v747_v59 }
 0x464   : > { %v793_v8 = vsel %vm792_vm9, %v790_v60, 0.0 }
 0x465   : > { %v794_v62 = vsel %vm791_vm10, %v748_v61, %v793_v8 }
 0x466   : > { %795 = vst [vmem:[%s348_s18] sm:$0x1] %v794_v62 }
 0x467 PF: > { %s21_s29 = sadd.s32 1, %s964_s29  }
 0x468   : > { %p18_p4 = scmp.ge.s32.totalorder %s21_s29, 6  }
 0x46a   :  { %20 = sbr.rel (!%p18_p4) target bundleno = 3 (0x3), region = 96 }

</bundles_post_ra>
